<compile_context>
chip_gen: v7x
topology: tpu7x:2x2x1
jax: 0.10.0
libtpu: 0.0.40
codegen_flags: <defaults>
</compile_context>

<pallas_src>
import functools

import jax
import jax.numpy as jnp
from jax import lax
from jax.experimental import pallas as pl
from jax.experimental.pallas import tpu as pltpu


def _round_up(x, m):
    return (x + m - 1) // m * m


def _softmax_over_batch(z_list):
    """Softmax across the python-list (= batch) axis, element-wise in (row, lane)."""
    m = z_list[0]
    for z in z_list[1:]:
        m = jnp.maximum(m, z)
    e_list = [jnp.exp(z - m) for z in z_list]
    den = e_list[0]
    for e in e_list[1:]:
        den = den + e
    inv = pl.reciprocal(den, approx=True)          # EUP slot, effectively free
    return [e * inv for e in e_list]


# ----------------------------- pass 1: gather ------------------------------ #
def _gather_kernel(x_ref, w1_ref, b1_ref, w2_ref, b2_ref, g_ref, acc_ref,
                   *, bsz, s_actual, need_mask):
    """x_ref: (B, C, T) bf16; w1/w2 pinned bf16; b1/b2 pinned f32 columns;
       acc_ref: (B, Cm_pad, Cn_pad) f32 scratch accumulator;
       g_ref: (1, B, Cm_pad, Cn_pad) output block, written once on last tile."""
    i = pl.program_id(1)

    @pl.when(i == 0)
    def _init():
        acc_ref[...] = jnp.zeros_like(acc_ref)

    w1 = w1_ref[...]
    w2 = w2_ref[...]
    tile_s = x_ref.shape[-1]
    # Hoist bias broadcasts out of the per-batch loops (JAX does not CSE them).
    b1 = jnp.broadcast_to(b1_ref[...], (w1.shape[0], tile_s))
    b2 = jnp.broadcast_to(b2_ref[...], (w2.shape[0], tile_s))

    lane_mask = None
    if need_mask:   # compile-time flag: only traced when S was padded
        base = (pl.program_id(0) * pl.num_programs(1) + i) * tile_s
        pos = base + lax.broadcasted_iota(jnp.int32, (1, tile_s), 1)
        lane_mask = (pos < s_actual).astype(jnp.float32)

    # conv2 logits for every batch element first (the softmax couples batches)...
    b_list = [jnp.dot(w2, x_ref[bi], preferred_element_type=jnp.float32) + b2
              for bi in range(bsz)]
    attm = _softmax_over_batch(b_list)   # softmax over BATCH (torch implicit dim=0)

    # ...then recompute A per batch right before use: keeps live ranges small
    # (the unrolled batch loop does not bound live ranges; recompute is cheaper
    # than spilling for production B).
    for bi in range(bsz):
        a = jnp.dot(w1, x_ref[bi], preferred_element_type=jnp.float32) + b1
        if need_mask:
            a = a * lane_mask            # zero contributions of padded S lanes
        # gathered[m, n] += sum_s A[m, s] * attm[n, s]
        # TODO(synk): check the Mosaic dump for an XLU vxpose feeding this
        # transposed contraction and restructure operand layout if present.
        acc_ref[bi] = acc_ref[bi] + lax.dot_general(
            a, attm[bi], (((1,), (1,)), ((), ())),
            preferred_element_type=jnp.float32)

    @pl.when(i == pl.num_programs(1) - 1)
    def _finalize():
        g_ref[0] = acc_ref[...]


# --------------------------- pass 2: distribute ----------------------------- #
def _distribute_kernel(x_ref, wg_ref, w3_ref, b3_ref, bo_ref, o_ref, *, bsz):
    """x_ref: (B, C, T) bf16; wg_ref: (B, C, Cn_pad) f32 (conv_out already folded
       into gathered); w3 pinned bf16; b3/bo pinned f32; o_ref: (B, C, T) f32."""
    w3 = w3_ref[...]
    tile_s = x_ref.shape[-1]
    b3 = jnp.broadcast_to(b3_ref[...], (w3.shape[0], tile_s))
    bo = jnp.broadcast_to(bo_ref[...], (bo_ref.shape[0], tile_s))

    v_list = [jnp.dot(w3, x_ref[bi], preferred_element_type=jnp.float32) + b3
              for bi in range(bsz)]
    attv = _softmax_over_batch(v_list)   # softmax over BATCH (torch implicit dim=0)

    for bi in range(bsz):
        # Single matmul per batch: wg = wo @ gathered was folded in the wrapper.
        out_b = jnp.dot(wg_ref[bi], attv[bi],
                        preferred_element_type=jnp.float32) + bo      # (C, T)
        # Residual fused into the single lane-dense (C, T) store per batch.
        o_ref[bi] = (x_ref[bi].astype(jnp.float32) + out_b).astype(o_ref.dtype)


# -------------------------------- wrapper ----------------------------------- #
def a2network_pallas(x, params, *, tile_s=None, compute_dtype=jnp.bfloat16):
    """x: (B, C, H, W) float32. params: (w1, b1, w2, b2, w3, b3, wo, bo)."""
    w1, b1, w2, b2, w3, b3, wo, bo = params
    b, c, h, w = x.shape
    cm = w1.shape[0]
    cn = w2.shape[0]
    s = h * w
    s_pad = _round_up(s, 128)

    f32 = jnp.float32
    cdt = compute_dtype
    cpad = 16 if cdt == jnp.bfloat16 else 8   # bf16 sublane tile is (16, 128)
    cm_pad = _round_up(cm, cpad)
    cn_pad = _round_up(cn, cpad)

    in_bytes = jnp.dtype(cdt).itemsize
    out_bytes = 4   # TODO(synk): bf16 output for pass 2 is a further BW win.

    def tile_bytes(t):
        # Pass-2 dominates: double-buffered x input + double-buffered f32 output.
        return 2 * b * c * t * in_bytes + 2 * b * c * t * out_bytes

    if tile_s is None:
        budget = 40 * 1024 * 1024     # keeps headroom under v7x's 64 MiB VMEM
        tile_s = 128
        for t in sorted({s_pad, 2048, 1024, 512, 256, 128}, reverse=True):
            if t <= s_pad and s_pad % t == 0 and tile_bytes(t) <= budget:
                tile_s = t
                break
    assert tile_s % 128 == 0 and s_pad % tile_s == 0
    n_tiles = s_pad // tile_s

    # Split the pass-1 S reduction two ways (uses both v7x TCs; harmless on
    # single-TC v5e/v6e where the two halves just run back-to-back).
    n_split = 2 if (n_tiles >= 2 and n_tiles % 2 == 0) else 1
    tiles_per_split = n_tiles // n_split

    vmem_limit = int(min(56 << 20, max(32 << 20, tile_bytes(tile_s) * 2)))

    # ---- pack / pad weights & x outside the kernels (layout plumbing) ----
    xp = x.reshape(b, c, s).astype(cdt)
    if s_pad != s:
        xp = jnp.pad(xp, ((0, 0), (0, 0), (0, s_pad - s)))

    w1p = jnp.zeros((cm_pad, c), cdt).at[:cm].set(w1.astype(cdt))
    b1p = jnp.zeros((cm_pad, 1), f32).at[:cm, 0].set(b1.astype(f32))
    w2p = jnp.zeros((cn_pad, c), cdt).at[:cn].set(w2.astype(cdt))
    b2p = jnp.zeros((cn_pad, 1), f32).at[:cn, 0].set(b2.astype(f32))
    w3p = jnp.zeros((cn_pad, c), cdt).at[:cn].set(w3.astype(cdt))
    b3p = jnp.zeros((cn_pad, 1), f32).at[:cn, 0].set(b3.astype(f32))
    bop = bo.astype(f32).reshape(c, 1)

    # ---------------- pass 1: accumulate gathered over S tiles --------------- #
    partials = pl.pallas_call(
        functools.partial(_gather_kernel, bsz=b, s_actual=s,
                          need_mask=(s_pad != s)),
        out_shape=jax.ShapeDtypeStruct((n_split, b, cm_pad, cn_pad), f32),
        grid=(n_split, tiles_per_split),
        in_specs=[
            pl.BlockSpec((b, c, tile_s),
                         lambda cs, i, tps=tiles_per_split: (0, 0, cs * tps + i)),
            pl.BlockSpec((cm_pad, c), lambda cs, i: (0, 0)),   # pinned
            pl.BlockSpec((cm_pad, 1), lambda cs, i: (0, 0)),   # pinned
            pl.BlockSpec((cn_pad, c), lambda cs, i: (0, 0)),   # pinned
            pl.BlockSpec((cn_pad, 1), lambda cs, i: (0, 0)),   # pinned
        ],
        out_specs=pl.BlockSpec((1, b, cm_pad, cn_pad),
                               lambda cs, i: (cs, 0, 0, 0)),
        scratch_shapes=[pltpu.VMEM((b, cm_pad, cn_pad), f32)],
        compiler_params=pltpu.CompilerParams(
            dimension_semantics=("parallel", "arbitrary"),
            vmem_limit_bytes=vmem_limit),
    )(xp, w1p, b1p, w2p, b2p)

    gathered = jnp.sum(partials, axis=0)                       # (B, Cm_pad, Cn_pad)

    # Zero the padded Cn columns: the batch-axis softmax of zero-padded rows is
    # 1/B (not 0), so they must not reach the distribute step.  Then fold the
    # output 1x1 conv into gathered (tiny B*C*Cn matrix).
    nmask = (jnp.arange(cn_pad) < cn).astype(f32)
    gathered = gathered * nmask[None, None, :]
    wg = jnp.einsum('cm,bmn->bcn', wo.astype(f32), gathered[:, :cm, :])  # (B,C,Cn_pad)

    # ---------------- pass 2: distribute + conv_out + residual --------------- #
    out = pl.pallas_call(
        functools.partial(_distribute_kernel, bsz=b),
        out_shape=jax.ShapeDtypeStruct((b, c, s_pad), f32),
        grid=(n_tiles,),
        in_specs=[
            pl.BlockSpec((b, c, tile_s), lambda i: (0, 0, i)),
            pl.BlockSpec((b, c, cn_pad), lambda i: (0, 0, 0)),   # pinned
            pl.BlockSpec((cn_pad, c), lambda i: (0, 0)),         # pinned
            pl.BlockSpec((cn_pad, 1), lambda i: (0, 0)),         # pinned
            pl.BlockSpec((c, 1), lambda i: (0, 0)),              # pinned
        ],
        out_specs=pl.BlockSpec((b, c, tile_s), lambda i: (0, 0, i)),
        compiler_params=pltpu.CompilerParams(
            dimension_semantics=("parallel",),
            vmem_limit_bytes=vmem_limit),
    )(xp, wg, w3p, b3p, bop)

    if s_pad != s:
        out = out[:, :, :s]
    return out.reshape(b, c, h, w)


# ------------------------------ pure-JAX reference --------------------------- #
def a2network_ref(x, params):
    """Mirrors the PyTorch forward (including the implicit batch-axis softmax)."""
    w1, b1, w2, b2, w3, b3, wo, bo = params
    b, c, h, w = x.shape
    s = h * w
    xf = x.reshape(b, c, s)
    A = jnp.einsum('mc,bcs->bms', w1, xf) + b1[None, :, None]
    B = jnp.einsum('nc,bcs->bns', w2, xf) + b2[None, :, None]
    V = jnp.einsum('nc,bcs->bns', w3, xf) + b3[None, :, None]
    att_maps = jax.nn.softmax(B, axis=0)      # implicit dim=0 in torch (3-D input)
    att_vecs = jax.nn.softmax(V, axis=0)
    gathered = jnp.einsum('bms,bns->bmn', A, att_maps)
    distributed = jnp.einsum('bmn,bns->bms', gathered, att_vecs)
    out = jnp.einsum('cm,bms->bcs', wo, distributed) + bo[None, :, None]
    return x + out.reshape(b, c, h, w)


def init_params(key, in_features, cm, cn):
    ks = jax.random.split(key, 8)
    scale = 0.1
    w1 = scale * jax.random.normal(ks[0], (cm, in_features), jnp.float32)
    b1 = scale * jax.random.normal(ks[1], (cm,), jnp.float32)
    w2 = scale * jax.random.normal(ks[2], (cn, in_features), jnp.float32)
    b2 = scale * jax.random.normal(ks[3], (cn,), jnp.float32)
    w3 = scale * jax.random.normal(ks[4], (cn, in_features), jnp.float32)
    b3 = scale * jax.random.normal(ks[5], (cn,), jnp.float32)
    wo = scale * jax.random.normal(ks[6], (in_features, cm), jnp.float32)
    bo = scale * jax.random.normal(ks[7], (in_features,), jnp.float32)
    return (w1, b1, w2, b2, w3, b3, wo, bo)


if __name__ == "__main__":
    B, C, H, W = 2, 4, 16, 16
    CM, CN = 8, 6

    key = jax.random.PRNGKey(0)
    kx, kp, kx2 = jax.random.split(key, 3)
    x = jax.random.normal(kx, (B, C, H, W), jnp.float32)
    params = init_params(kp, C, CM, CN)

    # bf16 inputs/weights => loosened tolerance vs. the exact f32 reference.
    tol = dict(atol=5e-2, rtol=5e-2)

    ref = a2network_ref(x, params)

    # 1) default tiling (single tile).
    out = jax.block_until_ready(jax.jit(a2network_pallas)(x, params))
    assert out.shape == (B, C, H, W)
    assert jnp.allclose(out, ref, **tol), \
        f"max abs err {jnp.max(jnp.abs(out - ref))}"

    # 2) forced small tile: exercises the cross-tile accumulator and the 2-way
    #    "parallel" split of the pass-1 reduction.
    out2 = jax.block_until_ready(
        jax.jit(functools.partial(a2network_pallas, tile_s=128))(x, params))
    assert jnp.allclose(out2, ref, **tol), \
        f"max abs err {jnp.max(jnp.abs(out2 - ref))}"

    # 3) spatial size not a multiple of 128: exercises S padding + lane masking.
    x3 = jax.random.normal(kx2, (B, C, 10, 13), jnp.float32)
    out3 = jax.block_until_ready(jax.jit(a2network_pallas)(x3, params))
    ref3 = a2network_ref(x3, params)
    assert jnp.allclose(out3, ref3, **tol), \
        f"max abs err {jnp.max(jnp.abs(out3 - ref3))}"

    print("KERNEL_OK")
</pallas_src>

<mosaic_0001>
module attributes {stable_mosaic.version = 11 : i64} {
  func.func @_gather_kernel(%arg0: i32, %arg1: i32, %arg2: memref<2x4x256xbf16, #tpu.memory_space<vmem>>, %arg3: memref<16x4xbf16, #tpu.memory_space<vmem>>, %arg4: memref<16x1xf32, #tpu.memory_space<vmem>>, %arg5: memref<16x4xbf16, #tpu.memory_space<vmem>>, %arg6: memref<16x1xf32, #tpu.memory_space<vmem>>, %arg7: memref<1x2x16x16xf32, #tpu.memory_space<vmem>>, %arg8: memref<2x16x16xf32, #tpu.memory_space<vmem>>) attributes {dimension_semantics = [#tpu.dimension_semantics<parallel>, #tpu.dimension_semantics<arbitrary>], iteration_bounds = array<i64: 1, 1>, scalar_prefetch = 0 : i64, scratch_operands = 1 : i64, tpu.core_type = #tpu.core_type<tc>, window_params = [{transform_indices = @transform_0, window_bounds = array<i64: 2, 4, 256>}, {pipeline_mode = #tpu.pipeline_mode<synchronous>, transform_indices = @transform_1, window_bounds = array<i64: 16, 4>}, {pipeline_mode = #tpu.pipeline_mode<synchronous>, transform_indices = @transform_2, window_bounds = array<i64: 16, 1>}, {pipeline_mode = #tpu.pipeline_mode<synchronous>, transform_indices = @transform_3, window_bounds = array<i64: 16, 4>}, {pipeline_mode = #tpu.pipeline_mode<synchronous>, transform_indices = @transform_4, window_bounds = array<i64: 16, 1>}, {transform_indices = @transform_5, window_bounds = array<i64: 1, 2, 16, 16>}]} {
    %c0_i32 = arith.constant 0 : i32
    %0 = arith.cmpi eq, %arg1, %c0_i32 : i32
    %1 = arith.extui %0 : i1 to i32
    %c0_i32_0 = arith.constant 0 : i32
    %2 = arith.cmpi ne, %1, %c0_i32_0 : i32
    scf.if %2 {
      %cst_38 = arith.constant 0.000000e+00 : f32
      %53 = vector.broadcast %cst_38 : f32 to vector<2x16x16xf32>
      %c0_39 = arith.constant 0 : index
      %c0_40 = arith.constant 0 : index
      %c0_41 = arith.constant 0 : index
      %54 = vector.load %arg8[%c0_39, %c0_40, %c0_41] : memref<2x16x16xf32, #tpu.memory_space<vmem>>, vector<2x16x16xf32>
      tpu.vector_store %arg8[%c0_39, %c0_40, %c0_41], %53 {strides = array<i32>} : memref<2x16x16xf32, #tpu.memory_space<vmem>>, vector<2x16x16xf32>,
    } else {
    }
    %c0 = arith.constant 0 : index
    %c0_1 = arith.constant 0 : index
    %3 = vector.load %arg3[%c0, %c0_1] : memref<16x4xbf16, #tpu.memory_space<vmem>>, vector<16x4xbf16>
    %c0_2 = arith.constant 0 : index
    %c0_3 = arith.constant 0 : index
    %4 = vector.load %arg5[%c0_2, %c0_3] : memref<16x4xbf16, #tpu.memory_space<vmem>>, vector<16x4xbf16>
    %c0_4 = arith.constant 0 : index
    %c0_5 = arith.constant 0 : index
    %5 = vector.load %arg4[%c0_4, %c0_5] : memref<16x1xf32, #tpu.memory_space<vmem>>, vector<16x1xf32>
    %6 = vector.shape_cast %5 : vector<16x1xf32> to vector<16x1xf32>
    %7 = vector.broadcast %6 : vector<16x1xf32> to vector<16x256xf32>
    %c0_6 = arith.constant 0 : index
    %c0_7 = arith.constant 0 : index
    %8 = vector.load %arg6[%c0_6, %c0_7] : memref<16x1xf32, #tpu.memory_space<vmem>>, vector<16x1xf32>
    %9 = vector.shape_cast %8 : vector<16x1xf32> to vector<16x1xf32>
    %10 = vector.broadcast %9 : vector<16x1xf32> to vector<16x256xf32>
    %c0_8 = arith.constant 0 : index
    %c0_9 = arith.constant 0 : index
    %c0_10 = arith.constant 0 : index
    %11 = vector.load %arg2[%c0_8, %c0_9, %c0_10] : memref<2x4x256xbf16, #tpu.memory_space<vmem>>, vector<1x4x256xbf16>
    %12 = vector.shape_cast %11 : vector<1x4x256xbf16> to vector<4x256xbf16>
    %cst = arith.constant dense<0.000000e+00> : vector<16x256xf32>
    %13 = tpu.matmul %4, %12, %cst {dimension_numbers = #tpu.dot_dimension_numbers<[1], [0], [0], [1], [0, 0, 1, 1], [], []>} : vector<16x4xbf16>, vector<4x256xbf16>, vector<16x256xf32> -> vector<16x256xf32>
    %14 = arith.addf %13, %10 : vector<16x256xf32>
    %c1 = arith.constant 1 : index
    %c0_11 = arith.constant 0 : index
    %c0_12 = arith.constant 0 : index
    %15 = vector.load %arg2[%c1, %c0_11, %c0_12] : memref<2x4x256xbf16, #tpu.memory_space<vmem>>, vector<1x4x256xbf16>
    %16 = vector.shape_cast %15 : vector<1x4x256xbf16> to vector<4x256xbf16>
    %cst_13 = arith.constant dense<0.000000e+00> : vector<16x256xf32>
    %17 = tpu.matmul %4, %16, %cst_13 {dimension_numbers = #tpu.dot_dimension_numbers<[1], [0], [0], [1], [0, 0, 1, 1], [], []>} : vector<16x4xbf16>, vector<4x256xbf16>, vector<16x256xf32> -> vector<16x256xf32>
    %18 = arith.addf %17, %10 : vector<16x256xf32>
    %19 = arith.maximumf %14, %18 : vector<16x256xf32>
    %20 = arith.subf %14, %19 : vector<16x256xf32>
    %21 = math.exp %20 : vector<16x256xf32>
    %22 = arith.subf %18, %19 : vector<16x256xf32>
    %23 = math.exp %22 : vector<16x256xf32>
    %24 = arith.addf %21, %23 : vector<16x256xf32>
    %25 = tpu.reciprocal %24 {approx = true} : vector<16x256xf32> -> vector<16x256xf32>
    %26 = arith.mulf %21, %25 : vector<16x256xf32>
    %27 = arith.mulf %23, %25 : vector<16x256xf32>
    %c0_14 = arith.constant 0 : index
    %c0_15 = arith.constant 0 : index
    %c0_16 = arith.constant 0 : index
    %28 = vector.load %arg2[%c0_14, %c0_15, %c0_16] : memref<2x4x256xbf16, #tpu.memory_space<vmem>>, vector<1x4x256xbf16>
    %29 = vector.shape_cast %28 : vector<1x4x256xbf16> to vector<4x256xbf16>
    %cst_17 = arith.constant dense<0.000000e+00> : vector<16x256xf32>
    %30 = tpu.matmul %3, %29, %cst_17 {dimension_numbers = #tpu.dot_dimension_numbers<[1], [0], [0], [1], [0, 0, 1, 1], [], []>} : vector<16x4xbf16>, vector<4x256xbf16>, vector<16x256xf32> -> vector<16x256xf32>
    %31 = arith.addf %30, %7 : vector<16x256xf32>
    %c0_18 = arith.constant 0 : index
    %c0_19 = arith.constant 0 : index
    %c0_20 = arith.constant 0 : index
    %32 = vector.load %arg8[%c0_18, %c0_19, %c0_20] : memref<2x16x16xf32, #tpu.memory_space<vmem>>, vector<1x16x16xf32>
    %33 = vector.shape_cast %32 : vector<1x16x16xf32> to vector<16x16xf32>
    %cst_21 = arith.constant dense<0.000000e+00> : vector<16x16xf32>
    %34 = tpu.matmul %31, %26, %cst_21 {dimension_numbers = #tpu.dot_dimension_numbers<[1], [1], [0], [0], [0, 0, 1, 0], [], []>} : vector<16x256xf32>, vector<16x256xf32>, vector<16x16xf32> -> vector<16x16xf32>
    %35 = arith.addf %33, %34 : vector<16x16xf32>
    %c0_22 = arith.constant 0 : index
    %c0_23 = arith.constant 0 : index
    %c0_24 = arith.constant 0 : index
    %36 = vector.load %arg8[%c0_22, %c0_23, %c0_24] : memref<2x16x16xf32, #tpu.memory_space<vmem>>, vector<1x16x16xf32>
    %37 = vector.shape_cast %36 : vector<1x16x16xf32> to vector<16x16xf32>
    %38 = vector.shape_cast %35 : vector<16x16xf32> to vector<1x16x16xf32>
    tpu.vector_store %arg8[%c0_22, %c0_23, %c0_24], %38 {strides = array<i32>} : memref<2x16x16xf32, #tpu.memory_space<vmem>>, vector<1x16x16xf32>,
    %c1_25 = arith.constant 1 : index
    %c0_26 = arith.constant 0 : index
    %c0_27 = arith.constant 0 : index
    %39 = vector.load %arg2[%c1_25, %c0_26, %c0_27] : memref<2x4x256xbf16, #tpu.memory_space<vmem>>, vector<1x4x256xbf16>
    %40 = vector.shape_cast %39 : vector<1x4x256xbf16> to vector<4x256xbf16>
    %cst_28 = arith.constant dense<0.000000e+00> : vector<16x256xf32>
    %41 = tpu.matmul %3, %40, %cst_28 {dimension_numbers = #tpu.dot_dimension_numbers<[1], [0], [0], [1], [0, 0, 1, 1], [], []>} : vector<16x4xbf16>, vector<4x256xbf16>, vector<16x256xf32> -> vector<16x256xf32>
    %42 = arith.addf %41, %7 : vector<16x256xf32>
    %c1_29 = arith.constant 1 : index
    %c0_30 = arith.constant 0 : index
    %c0_31 = arith.constant 0 : index
    %43 = vector.load %arg8[%c1_29, %c0_30, %c0_31] : memref<2x16x16xf32, #tpu.memory_space<vmem>>, vector<1x16x16xf32>
    %44 = vector.shape_cast %43 : vector<1x16x16xf32> to vector<16x16xf32>
    %cst_32 = arith.constant dense<0.000000e+00> : vector<16x16xf32>
    %45 = tpu.matmul %42, %27, %cst_32 {dimension_numbers = #tpu.dot_dimension_numbers<[1], [1], [0], [0], [0, 0, 1, 0], [], []>} : vector<16x256xf32>, vector<16x256xf32>, vector<16x16xf32> -> vector<16x16xf32>
    %46 = arith.addf %44, %45 : vector<16x16xf32>
    %c1_33 = arith.constant 1 : index
    %c0_34 = arith.constant 0 : index
    %c0_35 = arith.constant 0 : index
    %47 = vector.load %arg8[%c1_33, %c0_34, %c0_35] : memref<2x16x16xf32, #tpu.memory_space<vmem>>, vector<1x16x16xf32>
    %48 = vector.shape_cast %47 : vector<1x16x16xf32> to vector<16x16xf32>
    %49 = vector.shape_cast %46 : vector<16x16xf32> to vector<1x16x16xf32>
    tpu.vector_store %arg8[%c1_33, %c0_34, %c0_35], %49 {strides = array<i32>} : memref<2x16x16xf32, #tpu.memory_space<vmem>>, vector<1x16x16xf32>,
    %c0_i32_36 = arith.constant 0 : i32
    %50 = arith.cmpi eq, %arg1, %c0_i32_36 : i32
    %51 = arith.extui %50 : i1 to i32
    %c0_i32_37 = arith.constant 0 : i32
    %52 = arith.cmpi ne, %51, %c0_i32_37 : i32
    scf.if %52 {
      %c0_38 = arith.constant 0 : index
      %c0_39 = arith.constant 0 : index
      %c0_40 = arith.constant 0 : index
      %53 = vector.load %arg8[%c0_38, %c0_39, %c0_40] : memref<2x16x16xf32, #tpu.memory_space<vmem>>, vector<2x16x16xf32>
      %c0_41 = arith.constant 0 : index
      %c0_42 = arith.constant 0 : index
      %c0_43 = arith.constant 0 : index
      %c0_44 = arith.constant 0 : index
      %54 = vector.load %arg7[%c0_41, %c0_42, %c0_43, %c0_44] : memref<1x2x16x16xf32, #tpu.memory_space<vmem>>, vector<1x2x16x16xf32>
      %55 = vector.shape_cast %54 : vector<1x2x16x16xf32> to vector<2x16x16xf32>
      %56 = vector.shape_cast %53 : vector<2x16x16xf32> to vector<1x2x16x16xf32>
      tpu.vector_store %arg7[%c0_41, %c0_42, %c0_43, %c0_44], %56 {strides = array<i32>} : memref<1x2x16x16xf32, #tpu.memory_space<vmem>>, vector<1x2x16x16xf32>,
    } else {
    }
    return
  }
  func.func @transform_0(%arg0: i32, %arg1: i32) -> (i32, i32, i32) {
    %c1_i32 = arith.constant 1 : i32
    %0 = arith.muli %arg0, %c1_i32 : i32
    %1 = arith.addi %0, %arg1 : i32
    %c0_i32 = arith.constant 0 : i32
    %c0_i32_0 = arith.constant 0 : i32
    %c0_i32_1 = arith.constant 0 : i32
    return %c0_i32, %c0_i32_0, %1 : i32, i32, i32
  }
  func.func @transform_1(%arg0: i32, %arg1: i32) -> (i32, i32) {
    %c0_i32 = arith.constant 0 : i32
    %c0_i32_0 = arith.constant 0 : i32
    %c0_i32_1 = arith.constant 0 : i32
    return %c0_i32, %c0_i32_0 : i32, i32
  }
  func.func @transform_2(%arg0: i32, %arg1: i32) -> (i32, i32) {
    %c0_i32 = arith.constant 0 : i32
    %c0_i32_0 = arith.constant 0 : i32
    %c0_i32_1 = arith.constant 0 : i32
    return %c0_i32, %c0_i32_0 : i32, i32
  }
  func.func @transform_3(%arg0: i32, %arg1: i32) -> (i32, i32) {
    %c0_i32 = arith.constant 0 : i32
    %c0_i32_0 = arith.constant 0 : i32
    %c0_i32_1 = arith.constant 0 : i32
    return %c0_i32, %c0_i32_0 : i32, i32
  }
  func.func @transform_4(%arg0: i32, %arg1: i32) -> (i32, i32) {
    %c0_i32 = arith.constant 0 : i32
    %c0_i32_0 = arith.constant 0 : i32
    %c0_i32_1 = arith.constant 0 : i32
    return %c0_i32, %c0_i32_0 : i32, i32
  }
  func.func @transform_5(%arg0: i32, %arg1: i32) -> (i32, i32, i32, i32) {
    %c0_i32 = arith.constant 0 : i32
    %c0_i32_0 = arith.constant 0 : i32
    %c0_i32_1 = arith.constant 0 : i32
    %c0_i32_2 = arith.constant 0 : i32
    return %arg0, %c0_i32, %c0_i32_0, %c0_i32_1 : i32, i32, i32, i32
  }
}

module attributes {stable_mosaic.version = 11 : i64} {
  func.func @_distribute_kernel(%arg0: i32, %arg1: memref<2x4x256xbf16, #tpu.memory_space<vmem>>, %arg2: memref<2x4x16xf32, #tpu.memory_space<vmem>>, %arg3: memref<16x4xbf16, #tpu.memory_space<vmem>>, %arg4: memref<16x1xf32, #tpu.memory_space<vmem>>, %arg5: memref<4x1xf32, #tpu.memory_space<vmem>>, %arg6: memref<2x4x256xf32, #tpu.memory_space<vmem>>) attributes {dimension_semantics = [#tpu.dimension_semantics<parallel>], iteration_bounds = array<i64: 1>, scalar_prefetch = 0 : i64, scratch_operands = 0 : i64, tpu.core_type = #tpu.core_type<tc>, window_params = [{transform_indices = @transform_0, window_bounds = array<i64: 2, 4, 256>}, {pipeline_mode = #tpu.pipeline_mode<synchronous>, transform_indices = @transform_1, window_bounds = array<i64: 2, 4, 16>}, {pipeline_mode = #tpu.pipeline_mode<synchronous>, transform_indices = @transform_2, window_bounds = array<i64: 16, 4>}, {pipeline_mode = #tpu.pipeline_mode<synchronous>, transform_indices = @transform_3, window_bounds = array<i64: 16, 1>}, {pipeline_mode = #tpu.pipeline_mode<synchronous>, transform_indices = @transform_4, window_bounds = array<i64: 4, 1>}, {transform_indices = @transform_5, window_bounds = array<i64: 2, 4, 256>}]} {
    %c0 = arith.constant 0 : index
    %c0_0 = arith.constant 0 : index
    %0 = vector.load %arg3[%c0, %c0_0] : memref<16x4xbf16, #tpu.memory_space<vmem>>, vector<16x4xbf16>
    %c0_1 = arith.constant 0 : index
    %c0_2 = arith.constant 0 : index
    %1 = vector.load %arg4[%c0_1, %c0_2] : memref<16x1xf32, #tpu.memory_space<vmem>>, vector<16x1xf32>
    %2 = vector.shape_cast %1 : vector<16x1xf32> to vector<16x1xf32>
    %3 = vector.broadcast %2 : vector<16x1xf32> to vector<16x256xf32>
    %c0_3 = arith.constant 0 : index
    %c0_4 = arith.constant 0 : index
    %4 = vector.load %arg5[%c0_3, %c0_4] : memref<4x1xf32, #tpu.memory_space<vmem>>, vector<4x1xf32>
    %5 = vector.shape_cast %4 : vector<4x1xf32> to vector<4x1xf32>
    %6 = vector.broadcast %5 : vector<4x1xf32> to vector<4x256xf32>
    %c0_5 = arith.constant 0 : index
    %c0_6 = arith.constant 0 : index
    %c0_7 = arith.constant 0 : index
    %7 = vector.load %arg1[%c0_5, %c0_6, %c0_7] : memref<2x4x256xbf16, #tpu.memory_space<vmem>>, vector<1x4x256xbf16>
    %8 = vector.shape_cast %7 : vector<1x4x256xbf16> to vector<4x256xbf16>
    %cst = arith.constant dense<0.000000e+00> : vector<16x256xf32>
    %9 = tpu.matmul %0, %8, %cst {dimension_numbers = #tpu.dot_dimension_numbers<[1], [0], [0], [1], [0, 0, 1, 1], [], []>} : vector<16x4xbf16>, vector<4x256xbf16>, vector<16x256xf32> -> vector<16x256xf32>
    %10 = arith.addf %9, %3 : vector<16x256xf32>
    %c1 = arith.constant 1 : index
    %c0_8 = arith.constant 0 : index
    %c0_9 = arith.constant 0 : index
    %11 = vector.load %arg1[%c1, %c0_8, %c0_9] : memref<2x4x256xbf16, #tpu.memory_space<vmem>>, vector<1x4x256xbf16>
    %12 = vector.shape_cast %11 : vector<1x4x256xbf16> to vector<4x256xbf16>
    %cst_10 = arith.constant dense<0.000000e+00> : vector<16x256xf32>
    %13 = tpu.matmul %0, %12, %cst_10 {dimension_numbers = #tpu.dot_dimension_numbers<[1], [0], [0], [1], [0, 0, 1, 1], [], []>} : vector<16x4xbf16>, vector<4x256xbf16>, vector<16x256xf32> -> vector<16x256xf32>
    %14 = arith.addf %13, %3 : vector<16x256xf32>
    %15 = arith.maximumf %10, %14 : vector<16x256xf32>
    %16 = arith.subf %10, %15 : vector<16x256xf32>
    %17 = math.exp %16 : vector<16x256xf32>
    %18 = arith.subf %14, %15 : vector<16x256xf32>
    %19 = math.exp %18 : vector<16x256xf32>
    %20 = arith.addf %17, %19 : vector<16x256xf32>
    %21 = tpu.reciprocal %20 {approx = true} : vector<16x256xf32> -> vector<16x256xf32>
    %22 = arith.mulf %17, %21 : vector<16x256xf32>
    %23 = arith.mulf %19, %21 : vector<16x256xf32>
    %c0_11 = arith.constant 0 : index
    %c0_12 = arith.constant 0 : index
    %c0_13 = arith.constant 0 : index
    %24 = vector.load %arg2[%c0_11, %c0_12, %c0_13] : memref<2x4x16xf32, #tpu.memory_space<vmem>>, vector<1x4x16xf32>
    %25 = vector.shape_cast %24 : vector<1x4x16xf32> to vector<4x16xf32>
    %cst_14 = arith.constant dense<0.000000e+00> : vector<4x256xf32>
    %26 = tpu.matmul %25, %22, %cst_14 {dimension_numbers = #tpu.dot_dimension_numbers<[1], [0], [0], [1], [0, 0, 1, 1], [], []>} : vector<4x16xf32>, vector<16x256xf32>, vector<4x256xf32> -> vector<4x256xf32>
    %27 = arith.addf %26, %6 : vector<4x256xf32>
    %c0_15 = arith.constant 0 : index
    %c0_16 = arith.constant 0 : index
    %c0_17 = arith.constant 0 : index
    %28 = vector.load %arg1[%c0_15, %c0_16, %c0_17] : memref<2x4x256xbf16, #tpu.memory_space<vmem>>, vector<1x4x256xbf16>
    %29 = vector.shape_cast %28 : vector<1x4x256xbf16> to vector<4x256xbf16>
    %30 = arith.extf %29 : vector<4x256xbf16> to vector<4x256xf32>
    %31 = arith.addf %30, %27 : vector<4x256xf32>
    %c0_18 = arith.constant 0 : index
    %c0_19 = arith.constant 0 : index
    %c0_20 = arith.constant 0 : index
    %32 = vector.load %arg6[%c0_18, %c0_19, %c0_20] : memref<2x4x256xf32, #tpu.memory_space<vmem>>, vector<1x4x256xf32>
    %33 = vector.shape_cast %32 : vector<1x4x256xf32> to vector<4x256xf32>
    %34 = vector.shape_cast %31 : vector<4x256xf32> to vector<1x4x256xf32>
    tpu.vector_store %arg6[%c0_18, %c0_19, %c0_20], %34 {strides = array<i32>} : memref<2x4x256xf32, #tpu.memory_space<vmem>>, vector<1x4x256xf32>,
    %c1_21 = arith.constant 1 : index
    %c0_22 = arith.constant 0 : index
    %c0_23 = arith.constant 0 : index
    %35 = vector.load %arg2[%c1_21, %c0_22, %c0_23] : memref<2x4x16xf32, #tpu.memory_space<vmem>>, vector<1x4x16xf32>
    %36 = vector.shape_cast %35 : vector<1x4x16xf32> to vector<4x16xf32>
    %cst_24 = arith.constant dense<0.000000e+00> : vector<4x256xf32>
    %37 = tpu.matmul %36, %23, %cst_24 {dimension_numbers = #tpu.dot_dimension_numbers<[1], [0], [0], [1], [0, 0, 1, 1], [], []>} : vector<4x16xf32>, vector<16x256xf32>, vector<4x256xf32> -> vector<4x256xf32>
    %38 = arith.addf %37, %6 : vector<4x256xf32>
    %c1_25 = arith.constant 1 : index
    %c0_26 = arith.constant 0 : index
    %c0_27 = arith.constant 0 : index
    %39 = vector.load %arg1[%c1_25, %c0_26, %c0_27] : memref<2x4x256xbf16, #tpu.memory_space<vmem>>, vector<1x4x256xbf16>
    %40 = vector.shape_cast %39 : vector<1x4x256xbf16> to vector<4x256xbf16>
    %41 = arith.extf %40 : vector<4x256xbf16> to vector<4x256xf32>
    %42 = arith.addf %41, %38 : vector<4x256xf32>
    %c1_28 = arith.constant 1 : index
    %c0_29 = arith.constant 0 : index
    %c0_30 = arith.constant 0 : index
    %43 = vector.load %arg6[%c1_28, %c0_29, %c0_30] : memref<2x4x256xf32, #tpu.memory_space<vmem>>, vector<1x4x256xf32>
    %44 = vector.shape_cast %43 : vector<1x4x256xf32> to vector<4x256xf32>
    %45 = vector.shape_cast %42 : vector<4x256xf32> to vector<1x4x256xf32>
    tpu.vector_store %arg6[%c1_28, %c0_29, %c0_30], %45 {strides = array<i32>} : memref<2x4x256xf32, #tpu.memory_space<vmem>>, vector<1x4x256xf32>,
    return
  }
  func.func @transform_0(%arg0: i32) -> (i32, i32, i32) {
    %c0_i32 = arith.constant 0 : i32
    %c0_i32_0 = arith.constant 0 : i32
    %c0_i32_1 = arith.constant 0 : i32
    return %c0_i32, %c0_i32_0, %arg0 : i32, i32, i32
  }
  func.func @transform_1(%arg0: i32) -> (i32, i32, i32) {
    %c0_i32 = arith.constant 0 : i32
    %c0_i32_0 = arith.constant 0 : i32
    %c0_i32_1 = arith.constant 0 : i32
    %c0_i32_2 = arith.constant 0 : i32
    return %c0_i32, %c0_i32_0, %c0_i32_1 : i32, i32, i32
  }
  func.func @transform_2(%arg0: i32) -> (i32, i32) {
    %c0_i32 = arith.constant 0 : i32
    %c0_i32_0 = arith.constant 0 : i32
    %c0_i32_1 = arith.constant 0 : i32
    return %c0_i32, %c0_i32_0 : i32, i32
  }
  func.func @transform_3(%arg0: i32) -> (i32, i32) {
    %c0_i32 = arith.constant 0 : i32
    %c0_i32_0 = arith.constant 0 : i32
    %c0_i32_1 = arith.constant 0 : i32
    return %c0_i32, %c0_i32_0 : i32, i32
  }
  func.func @transform_4(%arg0: i32) -> (i32, i32) {
    %c0_i32 = arith.constant 0 : i32
    %c0_i32_0 = arith.constant 0 : i32
    %c0_i32_1 = arith.constant 0 : i32
    return %c0_i32, %c0_i32_0 : i32, i32
  }
  func.func @transform_5(%arg0: i32) -> (i32, i32, i32) {
    %c0_i32 = arith.constant 0 : i32
    %c0_i32_0 = arith.constant 0 : i32
    %c0_i32_1 = arith.constant 0 : i32
    return %c0_i32, %c0_i32_0, %arg0 : i32, i32, i32
  }
}

</mosaic_0001>

<bundles_post_ra>
// kernel: a2network_pallas.2
= control target key start
LH: loop header
LB: loop body
LE: loop exit
PB: predicated region body
PF: predicated region fallthrough
CT: control target
= control target key end

     0   :  { %vm99_vm0 = vcmask 1041408   ;;  %v601_v1 = vmov 0   ;;  %vm95_vm1 = vcmask 31744   ;;  %vm47_vm2 = vcmask 130048   ;;  %s694_s0 = inlined_call_operand.vmem [shape: bf16[2,4,256], index: 0, kind: input, shape index: {}]   ;;  %s695_s3 = inlined_call_operand.vmem [shape: bf16[16,4], index: 3, kind: input, shape index: {}]   ;;  %s696_s4 = inlined_call_operand.vmem [shape: f32[16,1], index: 4, kind: input, shape index: {}]   ;;  %s697_s1 = inlined_call_operand.vmem [shape: bf16[16,4], index: 1, kind: input, shape index: {}]   ;;  %s698_s2 = inlined_call_operand.vmem [shape: f32[16,1], index: 2, kind: input, shape index: {}]   ;;  %s699_s5 = inlined_call_operand.vmem [shape: f32[1,2,16,16], index: 5, kind: output, shape index: {}]  }
   0x1   :  { %v549_v0 = vld.sshfl [vmem:[%s694_s0] sm:$0x33 pattern:$0x76325410]  ;;  %138 = vmatprep.mubr.bf16.mxu0 %v601_v1  ;;  %198 = vmatprep.mubr.bf16.mxu1 %v601_v1  ;;  %v69_v10 = vld [vmem:[%s696_s4 + $0x8] sm:$0xff]  ;;  %v602_v13 = vmov 0.0  }
   0x2   :  { %v94_v2 = vcombine.high %v549_v0, %v549_v0  ;;  %v560_v3 = vld.sshfl [vmem:[%s694_s0 + $0x4] sm:$0x33 pattern:$0x76325410]  ;;  %v101_v4 = vsel %vm99_vm0, %v549_v0, 0  ;;  %573 = vset.pattern.permute.xlu0 %v601_v1  ;;  %574 = vset.pattern.permute.xlu1 %v601_v1  ;;  %v57_v11 = vld [vmem:[%s698_s2 + $0x8] sm:$0xff] }
   0x3   :  { %v159_v5 = vcombine.high %v560_v3, %v560_v3  ;;  %v161_v6 = vsel %vm99_vm0, %v560_v3, 0  ;;  %v575_v7 = vld [vmem:[%s695_s3] sm:$0xff]   ;;  %48 = vst.msk [vmem:[#allocation2] sm:$0xff] %vm47_vm2, %v602_v13  ;;  %49 = vst.msk [vmem:[#allocation2 + $0x8] sm:$0xff] %vm47_vm2, %v602_v13 }
   0x4   :  { %550 = vmatprep.subr.msk.bf16.mxu0 %vm99_vm0, %v94_v2  ;;  %v68_v8 = vld [vmem:[%s696_s4] sm:$0xff]  ;;  %50 = vst.msk [vmem:[#allocation2 + $0x10] sm:$0xff] %vm47_vm2, %v602_v13  ;;  %51 = vst.msk [vmem:[#allocation2 + $0x18] sm:$0xff] %vm47_vm2, %v602_v13 }
   0x5   :  { %554 = vmatprep.subr.msk.bf16.mxu1 %vm99_vm0, %v159_v5  ;;  %107 = vmatpush1.bf16.msra.mxu0 %v101_v4  ;;  %v56_v9 = vld [vmem:[%s698_s2] sm:$0xff] }
   0x6   :  { %167 = vmatpush1.bf16.msra.mxu1 %v161_v6  ;;  %557 = vmatprep.subr.msk.bf16.mxu0 %vm99_vm0, %v94_v2  ;;  %v576_v12 = vld [vmem:[%s697_s1] sm:$0xff]  }
   0x7   :  { %72 = vperm.xlu0 %573, %v68_v8   ;;  %60 = vperm.xlu1 %574, %v56_v9  }
   0x8   :  { %551 = vmatmul.mubr.msk.bf16.vlgmr.msra.gmra.mrb[0].mxu0 %vm95_vm1, %v575_v7 }
   0x9   :  { %555 = vmatmul.mubr.msk.bf16.vlgmr.msra.gmra.mrb[0].mxu1 %vm95_vm1, %v575_v7  ;;  %262 = vmatpush1.bf16.msra.mxu0 %v101_v4 }
   0xa   :  { %293 = vmatprep.mubr.bf16.mxu0 %v601_v1  ;;  %561 = vmatprep.subr.msk.bf16.mxu0 %vm99_vm0, %v159_v5 }
   0xb   :  { %77 = vperm.xlu0 %573, %v69_v10   ;;  %65 = vperm.xlu1 %574, %v57_v11  }
  0x10   :  { %558 = vmatmul.mubr.msk.bf16.vlgmr.msra.gmra.mrb[4].mxu0 %vm95_vm1, %v576_v12 }
  0x11   :  { %403 = vmatpush1.bf16.msra.mxu0 %v161_v6  ;;  %434 = vmatprep.mubr.bf16.mxu0 %v601_v1 }
  0x18   :  { %562 = vmatmul.mubr.msk.bf16.vlgmr.msra.gmra.mrb[8].mxu0 %vm95_vm1, %v576_v12 }
  0x86   :  { %v73_v14 = vpop.permute.xlu0 %72  ;;  %v61_v53 = vpop.permute.xlu1 %60 }
  0x8a   :  { %v78_v15 = vpop.permute.xlu0 %77 }
  0xdb   :  { %v140_v16 = vpop.f32.mrb[0].mxu0 }
  0xdc   :  { %v141_v17 = vadd.f32 %v140_v16, %v73_v14  ;;  %v200_v18 = vpop.f32.mrb[0].mxu1  ;;  %v142_v19 = vpop.f32.mrb[1].mxu0 }
  0xdd   :  { %v201_v20 = vadd.f32 %v200_v18, %v73_v14  ;;  %v143_v21 = vadd.f32 %v142_v19, %v73_v14  ;;  %v202_v22 = vpop.f32.mrb[1].mxu1  ;;  %v144_v23 = vpop.f32.mrb[2].mxu0 }
  0xde   :  { %v203_v24 = vadd.f32 %v202_v22, %v73_v14  ;;  %v145_v25 = vadd.f32 %v144_v23, %v78_v15  ;;  %v204_v26 = vpop.f32.mrb[2].mxu1  ;;  %v146_v27 = vpop.f32.mrb[3].mxu0 }
  0xdf   :  { %v209_v28 = vmax.f32 %v141_v17, %v201_v20  ;;  %v205_v29 = vadd.f32 %v204_v26, %v78_v15  ;;  %v147_v30 = vadd.f32 %v146_v27, %v78_v15  ;;  %v206_v31 = vpop.f32.mrb[3].mxu1  ;;  %v66_v26 = vpop.permute.xlu1 %65 }
  0xe0   :  { %v210_v32 = vmax.f32 %v143_v21, %v203_v24  ;;  %v207_v33 = vadd.f32 %v206_v31, %v78_v15 }
  0xe1   :  { %v213_v34 = vsub.f32 %v141_v17, %v209_v28  ;;  %v225_v35 = vsub.f32 %v201_v20, %v209_v28  ;;  %v211_v36 = vmax.f32 %v145_v25, %v205_v29 }
  0xe2   :  { %v214_v37 = vsub.f32 %v143_v21, %v210_v32  ;;  %v226_v38 = vsub.f32 %v203_v24, %v210_v32  ;;  %v212_v39 = vmax.f32 %v147_v30, %v207_v33 }
  0xe3   :  { %v217_v40 = vmul.f32 1.442695, %v213_v34  ;;  %v229_v41 = vmul.f32 1.442695, %v225_v35  ;;  %v215_v42 = vsub.f32 %v145_v25, %v211_v36  ;;  %v227_v43 = vsub.f32 %v205_v29, %v211_v36  ;;  %v671_v44 = vpop.f32.mrb[4].mxu0  ;;  %v304_v34 = vld [vmem:[#allocation2] sm:$0xff] }
  0xe4   :  { %v219_v45 = vmul.f32 1.442695, %v214_v37  ;;  %v231_v46 = vmul.f32 1.442695, %v226_v38  ;;  %v216_v47 = vsub.f32 %v147_v30, %v212_v39  ;;  %v228_v48 = vsub.f32 %v207_v33, %v212_v39  ;;  %v297_v49 = vpop.f32.mrb[5].mxu0  ;;  %v305_v38 = vld [vmem:[#allocation2 + $0x8] sm:$0xff] }
  0xe5   :  { %577 = vpow2.f32 %v217_v40  ;;  %v221_v50 = vmul.f32 1.442695, %v215_v42  ;;  %v299_v51 = vpop.f32.mrb[6].mxu0  ;;  %v233_v52 = vmul.f32 1.442695, %v227_v43  ;;  %v298_v56 = vadd.f32 %v297_v49, %v61_v53  ;;  %v446_v42 = vld [vmem:[#allocation2 + $0x10] sm:$0xff] }
  0xe6   :  { %579 = vpow2.f32 %v229_v41  ;;  %v301_v54 = vpop.f32.mrb[7].mxu0  ;;  %v223_v55 = vmul.f32 1.442695, %v216_v47  ;;  %v235_v57 = vmul.f32 1.442695, %v228_v48  ;;  %v296_v27 = vadd.f32 %v671_v44, %v61_v53  ;;  %v447_v47 = vld [vmem:[#allocation2 + $0x18] sm:$0xff] }
  0xe7   :  { %581 = vpow2.f32 %v219_v45  ;;  %370 = vmatprep.mubr.f32.mxu1 %v298_v56  ;;  %v302_v28 = vadd.f32 %v301_v54, %v66_v26  ;;  %v300_v29 = vadd.f32 %v299_v51, %v66_v26 }
  0xe8   :  { %583 = vpow2.f32 %v231_v46 }
  0xe9   :  { %585 = vpow2.f32 %v221_v50 }
  0xea   :  { %587 = vpow2.f32 %v233_v52 }
  0xeb   :  { %589 = vpow2.f32 %v223_v55  ;;  %v436_v58 = vpop.f32.mrb[8].mxu0 }
  0xec   :  { %591 = vpow2.f32 %v235_v57  ;;  %v438_v59 = vpop.f32.mrb[9].mxu0  ;;  %v437_v31 = vadd.f32 %v436_v58, %v61_v53 }
  0xed   :  { %v440_v60 = vpop.f32.mrb[10].mxu0  ;;  %v439_v30 = vadd.f32 %v438_v59, %v61_v53 }
  0xee   :  { %v442_v61 = vpop.f32.mrb[11].mxu0  ;;  %v441_v33 = vadd.f32 %v440_v60, %v66_v26 }
  0xef   :  { %v578_v62 = vpop.eup %577  ;;  %v443_v32 = vadd.f32 %v442_v61, %v66_v26 }
  0xf0   :  { %v580_v63 = vpop.eup %579 }
  0xf1   :  { %v582_v0 = vpop.eup %581  ;;  %v237_v1 = vadd.f32 %v580_v63, %v578_v62 }
  0xf2   :  { %v584_v2 = vpop.eup %583 }
  0xf3   :  { %v586_v3 = vpop.eup %585  ;;  %593 = vrcp.f32 %v237_v1  ;;  %v238_v4 = vadd.f32 %v584_v2, %v582_v0 }
  0xf4   :  { %v588_v5 = vpop.eup %587 }
  0xf5   :  { %v590_v6 = vpop.eup %589  ;;  %595 = vrcp.f32 %v238_v4  ;;  %v239_v7 = vadd.f32 %v588_v5, %v586_v3 }
  0xf6   :  { %v592_v8 = vpop.eup %591 }
  0xf7   :  { %597 = vrcp.f32 %v239_v7  ;;  %v240_v9 = vadd.f32 %v592_v8, %v590_v6 }
  0xf9   :  { %599 = vrcp.f32 %v240_v9 }
  0xfd   :  { %v594_v10 = vpop.eup %593 }
  0xfe   :  { %v245_v11 = vmul.f32 %v594_v10, %v578_v62  ;;  %v249_v12 = vmul.f32 %v594_v10, %v580_v63 }
  0xff   :  { %v596_v13 = vpop.eup %595 }
 0x100   :  { %v246_v14 = vmul.f32 %v596_v13, %v582_v0  ;;  %v250_v15 = vmul.f32 %v596_v13, %v584_v2 }
 0x101   :  { %v598_v16 = vpop.eup %597 }
 0x102   :  { %v247_v17 = vmul.f32 %v598_v16, %v586_v3  ;;  %v251_v18 = vmul.f32 %v598_v16, %v588_v5 }
 0x103   :  { %v600_v19 = vpop.eup %599 }
 0x104   :  { %v248_v20 = vmul.f32 %v600_v19, %v590_v6  ;;  %v565_v21 = vpack.c.bf16 %v247_v17, %v245_v11  ;;  %v252_v22 = vmul.f32 %v600_v19, %v592_v8  ;;  %v569_v23 = vpack.c.bf16 %v251_v18, %v249_v12 }
 0x106   :  { %v563_v24 = vpack.c.bf16 %v248_v20, %v246_v14  ;;  %v567_v25 = vpack.c.bf16 %v252_v22, %v250_v15 }
 0x108   :  { %564 = vmatprep.subr.bf16.mxu1 %v563_v24 }
 0x109   :  { %566 = vmatpush1.bf16.xpose.msra.mxu1 %v565_v21 }
 0x10a   :  { %568 = vmatprep.subr.bf16.mxu1 %v567_v25 }
 0x110   :  { %371 = vmatmul.mubr.f32.vlgmr.msra.gmra.mrb[4].mxu1 %v296_v27 }
 0x111   :  { %375 = vmatprep.mubr.f32.mxu1 %v302_v28  ;;  %570 = vmatpush1.bf16.xpose.msra.mxu1 %v569_v23 }
 0x114   :  { %376 = vmatmul.mubr.f32.gmra.mrb[6].mxu1 %v300_v29 }
 0x115   :  { %512 = vmatprep.mubr.f32.mxu1 %v439_v30 }
 0x118   :  { %513 = vmatmul.mubr.f32.vlgmr.msra.gmra.mrb[8].mxu1 %v437_v31 }
 0x119   :  { %517 = vmatprep.mubr.f32.mxu1 %v443_v32 }
 0x11c   :  { %518 = vmatmul.mubr.f32.gmra.mrb[10].mxu1 %v441_v33 }
 0x1e3   :  { %v372_v35 = vpop.f32.mrb[4].mxu1 }
 0x1e4   :  { %v381_v36 = vadd.f32 %v372_v35, %v304_v34  ;;  %v374_v37 = vpop.f32.mrb[5].mxu1 }
 0x1e6   :  { %384 = vst.msk [vmem:[#allocation2] sm:$0xff] %vm47_vm2, %v381_v36 }
 0x1e7   :  { %v377_v39 = vpop.f32.mrb[6].mxu1 }
 0x1e8   :  { %v382_v40 = vadd.f32 %v377_v39, %v305_v38  ;;  %v379_v41 = vpop.f32.mrb[7].mxu1 }
 0x1ea   :  { %385 = vst.msk [vmem:[#allocation2 + $0x8] sm:$0xff] %vm47_vm2, %v382_v40 }
 0x1eb   :  { %v514_v43 = vpop.f32.mrb[8].mxu1 }
 0x1ec   :  { %v523_v44 = vadd.f32 %v514_v43, %v446_v42  ;;  %v516_v45 = vpop.f32.mrb[9].mxu1 }
 0x1ed   :  { %v530_v46 = vld [vmem:[#allocation2] sm:$0xff] }
 0x1ee   :  { %534 = vst.msk [vmem:[%s699_s5] sm:$0xff] %vm47_vm2, %v530_v46  ;;  %525 = vst.msk [vmem:[#allocation2 + $0x10] sm:$0xff] %vm47_vm2, %v523_v44 }
 0x1ef   :  { %v519_v48 = vpop.f32.mrb[10].mxu1 }
 0x1f0   :  { %v524_v49 = vadd.f32 %v519_v48, %v447_v47  ;;  %v521_v50 = vpop.f32.mrb[11].mxu1 }
 0x1f1   :  { %v531_v51 = vld [vmem:[#allocation2 + $0x8] sm:$0xff] }
 0x1f2   :  { %535 = vst.msk [vmem:[%s699_s5 + $0x8] sm:$0xff] %vm47_vm2, %v531_v51  ;;  %526 = vst.msk [vmem:[#allocation2 + $0x18] sm:$0xff] %vm47_vm2, %v524_v49 }
 0x1f5   :  { %v532_v52 = vld [vmem:[#allocation2 + $0x10] sm:$0xff] }
 0x1f6   :  { %536 = vst.msk [vmem:[%s699_s5 + $0x10] sm:$0xff] %vm47_vm2, %v532_v52 }
 0x1f9   :  { %v533_v53 = vld [vmem:[#allocation2 + $0x18] sm:$0xff] }
 0x1fa   :  { %537 = vst.msk [vmem:[%s699_s5 + $0x18] sm:$0xff] %vm47_vm2, %v533_v53 }

// kernel: a2network_pallas.3
= control target key start
LH: loop header
LB: loop body
LE: loop exit
PB: predicated region body
PF: predicated region fallthrough
CT: control target
= control target key end

     0   :  { %vm60_vm0 = vcmask 1041408   ;;  %v51_v0 = vlaneseq  ;;  %v436_v2 = vmov 0   ;;  %v437_v3 = vmov 1983009808   ;;  %s510_s0 = inlined_call_operand.vmem [shape: bf16[2,4,256], index: 0, kind: input, shape index: {}]   ;;  %s511_s3 = inlined_call_operand.vmem [shape: f32[16,1], index: 3, kind: input, shape index: {}]   ;;  %s512_s2 = inlined_call_operand.vmem [shape: bf16[16,4], index: 2, kind: input, shape index: {}]   ;;  %s513_s4 = inlined_call_operand.vmem [shape: f32[4,1], index: 4, kind: input, shape index: {}]   ;;  %s514_s1 = inlined_call_operand.vmem [shape: f32[2,4,16], index: 1, kind: input, shape index: {}]   ;;  %s515_s5 = inlined_call_operand.vmem [shape: f32[2,4,256], index: 5, kind: output, shape index: {}]  }
   0x1   :  { %v390_v1 = vld.sshfl [vmem:[%s510_s0 + $0x4] sm:$0x33 pattern:$0x76325410]  ;;  %159 = vmatprep.mubr.bf16.mxu1 %v436_v2  ;;  %v49_v4 = vunpack.c.l.s4 %v437_v3  ;;  %99 = vmatprep.mubr.bf16.mxu0 %v436_v2  ;;  %v480_v10 = vld [vmem:[%s510_s0] sm:$0xf] }
   0x2   :  { %v120_v5 = vcombine.high %v390_v1, %v390_v1  ;;  %v122_v6 = vsel %vm60_vm0, %v390_v1, 0  ;;  %v52_v7 = vshrl.u32 %v51_v0, 7  ;;  %409 = vset.pattern.permute.xlu0 %v436_v2  ;;  %410 = vset.pattern.permute.xlu1 %v436_v2  ;;  %v23_v9 = vld [vmem:[%s511_s3] sm:$0xff]  ;;  %vm56_vm1 = vcmask 31744   ;;  %v24_v13 = vld [vmem:[%s511_s3 + $0x8] sm:$0xff] }
   0x3   :  { %v50_v8 = vunpack.c.0.s8 %v49_v4  ;;  %v411_v11 = vld [vmem:[%s512_s2] sm:$0xff]   ;;  %27 = vperm.xlu0 %409, %v23_v9   ;;  %v438_v17 = vmov 0.0   ;;  %vm215_vm2 = vcmask 130048  }
   0x4   :  { %391 = vmatprep.subr.msk.bf16.mxu1 %vm60_vm0, %v120_v5  ;;  %v35_v18 = vld [vmem:[%s513_s4] sm:$0xf] }
   0x5   :  { %128 = vmatpush1.bf16.msra.mxu1 %v122_v6  ;;  %v53_v12 = vsub.s32 %v50_v8, %v52_v7  ;;  %38 = vperm.xlu1 %410, %v35_v18  }
   0x7   :  { %v54_v14 = vrot.slane %v480_v10, %v53_v12  ;;  %32 = vperm.xlu0 %409, %v24_v13  }
   0x8   :  { %392 = vmatmul.mubr.msk.bf16.vlgmr.msra.gmra.mrb[0].mxu1 %vm56_vm1, %v411_v11 }
   0x9   :  { %v55_v15 = vcombine.high %v54_v14, %v54_v14  ;;  %v62_v16 = vsel %vm60_vm0, %v54_v14, 0  ;;  %366 = vmatprep.mubr.f32.mxu1 %v438_v17 }
   0xb   :  { %387 = vmatprep.subr.msk.bf16.mxu0 %vm60_vm0, %v55_v15 }
   0xc   :  { %68 = vmatpush1.bf16.msra.mxu0 %v62_v16 }
   0xf   :  { %388 = vmatmul.mubr.msk.bf16.vlgmr.msra.gmra.mrb[0].mxu0 %vm56_vm1, %v411_v11 }
  0x10   :  { %283 = vmatprep.mubr.f32.mxu0 %v438_v17 }
  0x82   :  { %v28_v20 = vpop.permute.xlu0 %27 }
  0x86   :  { %v33_v25 = vpop.permute.xlu0 %32 }
  0xdb   :  { %v161_v19 = vpop.f32.mrb[0].mxu1 }
  0xdc   :  { %v163_v21 = vpop.f32.mrb[1].mxu1  ;;  %v162_v24 = vadd.f32 %v161_v19, %v28_v20 }
  0xdd   :  { %v165_v22 = vpop.f32.mrb[2].mxu1  ;;  %v164_v29 = vadd.f32 %v163_v21, %v28_v20 }
  0xde   :  { %v167_v23 = vpop.f32.mrb[3].mxu1  ;;  %v166_v32 = vadd.f32 %v165_v22, %v33_v25  ;;  %v214_v22 = vld [vmem:[%s514_s1] sm:$0xf] }
  0xdf   :  { %v168_v36 = vadd.f32 %v167_v23, %v33_v25  ;;  %v394_v23 = vld [vmem:[%s514_s1 + $0x4] sm:$0xf] }
  0xe2   :  { %v101_v26 = vpop.f32.mrb[0].mxu0 }
  0xe3   :  { %v102_v27 = vadd.f32 %v101_v26, %v28_v20  ;;  %v103_v28 = vpop.f32.mrb[1].mxu0 }
  0xe4   :  { %v104_v30 = vadd.f32 %v103_v28, %v28_v20  ;;  %v105_v31 = vpop.f32.mrb[2].mxu0 }
  0xe5   :  { %v170_v33 = vmax.f32 %v102_v27, %v162_v24  ;;  %v106_v34 = vadd.f32 %v105_v31, %v33_v25  ;;  %v107_v35 = vpop.f32.mrb[3].mxu0 }
  0xe6   :  { %v171_v37 = vmax.f32 %v104_v30, %v164_v29  ;;  %v108_v38 = vadd.f32 %v107_v35, %v33_v25  ;;  %v396_v25 = vld [vmem:[%s510_s0 + $0x4] sm:$0xf] }
  0xe7   :  { %v174_v39 = vsub.f32 %v102_v27, %v170_v33  ;;  %v186_v40 = vsub.f32 %v162_v24, %v170_v33  ;;  %v172_v41 = vmax.f32 %v106_v34, %v166_v32  ;;  %v39_v24 = vpop.permute.xlu1 %38  ;;  %v374_v35 = vunpack.c.l.bf16 %v396_v25 }
  0xe8   :  { %v175_v42 = vsub.f32 %v104_v30, %v171_v37  ;;  %v187_v43 = vsub.f32 %v164_v29, %v171_v37  ;;  %v173_v44 = vmax.f32 %v108_v38, %v168_v36 }
  0xe9   :  { %v178_v45 = vmul.f32 1.442695, %v174_v39  ;;  %v190_v46 = vmul.f32 1.442695, %v186_v40  ;;  %v176_v47 = vsub.f32 %v106_v34, %v172_v41  ;;  %v188_v48 = vsub.f32 %v166_v32, %v172_v41 }
  0xea   :  { %v180_v49 = vmul.f32 1.442695, %v175_v42  ;;  %v192_v50 = vmul.f32 1.442695, %v187_v43  ;;  %v177_v51 = vsub.f32 %v108_v38, %v173_v44  ;;  %v189_v52 = vsub.f32 %v168_v36, %v173_v44 }
  0xeb   :  { %412 = vpow2.f32 %v178_v45  ;;  %v182_v53 = vmul.f32 1.442695, %v176_v47  ;;  %v194_v54 = vmul.f32 1.442695, %v188_v48  ;;  %v290_v32 = vunpack.c.l.bf16 %v480_v10 }
  0xec   :  { %414 = vpow2.f32 %v190_v46  ;;  %v184_v55 = vmul.f32 1.442695, %v177_v51  ;;  %v196_v56 = vmul.f32 1.442695, %v189_v52 }
  0xed   :  { %416 = vpow2.f32 %v180_v49 }
  0xee   :  { %418 = vpow2.f32 %v192_v50 }
  0xef   :  { %420 = vpow2.f32 %v182_v53 }
  0xf0   :  { %422 = vpow2.f32 %v194_v54 }
  0xf1   :  { %424 = vpow2.f32 %v184_v55 }
  0xf2   :  { %426 = vpow2.f32 %v196_v56 }
  0xf5   :  { %v413_v57 = vpop.eup %412 }
  0xf6   :  { %v415_v58 = vpop.eup %414 }
  0xf7   :  { %v417_v59 = vpop.eup %416  ;;  %v198_v60 = vadd.f32 %v415_v58, %v413_v57 }
  0xf8   :  { %v419_v61 = vpop.eup %418 }
  0xf9   :  { %v421_v62 = vpop.eup %420  ;;  %428 = vrcp.f32 %v198_v60  ;;  %v199_v63 = vadd.f32 %v419_v61, %v417_v59 }
  0xfa   :  { %v423_v0 = vpop.eup %422 }
  0xfb   :  { %v425_v1 = vpop.eup %424  ;;  %430 = vrcp.f32 %v199_v63  ;;  %v200_v2 = vadd.f32 %v423_v0, %v421_v62 }
  0xfc   :  { %v427_v3 = vpop.eup %426 }
  0xfd   :  { %432 = vrcp.f32 %v200_v2  ;;  %v201_v4 = vadd.f32 %v427_v3, %v425_v1 }
  0xff   :  { %434 = vrcp.f32 %v201_v4 }
 0x103   :  { %v429_v5 = vpop.eup %428 }
 0x104   :  { %v206_v6 = vmul.f32 %v429_v5, %v413_v57  ;;  %v210_v7 = vmul.f32 %v429_v5, %v415_v58 }
 0x105   :  { %v431_v8 = vpop.eup %430 }
 0x106   :  { %v207_v9 = vmul.f32 %v431_v8, %v417_v59  ;;  %v211_v11 = vmul.f32 %v431_v8, %v419_v61 }
 0x107   :  { %v433_v12 = vpop.eup %432 }
 0x108   :  { %v208_v13 = vmul.f32 %v433_v12, %v421_v62  ;;  %v212_v14 = vmul.f32 %v433_v12, %v423_v0 }
 0x109   :  { %v435_v15 = vpop.eup %434 }
 0x10a   :  { %v209_v16 = vmul.f32 %v435_v15, %v425_v1  ;;  %v213_v17 = vmul.f32 %v435_v15, %v427_v3  ;;  %v400_v18 = vpack.c.bf16 %v208_v13, %v206_v6  ;;  %v404_v19 = vpack.c.bf16 %v212_v14, %v210_v7 }
 0x10c   :  { %v398_v20 = vpack.c.bf16 %v209_v16, %v207_v9  ;;  %v402_v21 = vpack.c.bf16 %v213_v17, %v211_v11 }
 0x10e   :  { %399 = vmatprep.subr.bf16.mxu0 %v398_v20  ;;  %403 = vmatprep.subr.bf16.mxu1 %v402_v21 }
 0x10f   :  { %401 = vmatpush1.bf16.msra.mxu0 %v400_v18  ;;  %405 = vmatpush1.bf16.msra.mxu1 %v404_v19 }
 0x112   :  { %393 = vmatmul.mubr.msk.f32.vlgmr.msra.gmra.mrb[4].mxu0 %vm215_vm2, %v214_v22  ;;  %395 = vmatmul.mubr.msk.f32.vlgmr.msra.gmra.mrb[4].mxu1 %vm215_vm2, %v394_v23 }
 0x1e5   :  { %v285_v26 = vpop.f32.mrb[4].mxu0  ;;  %v368_v27 = vpop.f32.mrb[4].mxu1 }
 0x1e6   :  { %v286_v28 = vadd.f32 %v285_v26, %v39_v24  ;;  %v369_v29 = vadd.f32 %v368_v27, %v39_v24  ;;  %v287_v30 = vpop.f32.mrb[5].mxu0  ;;  %v370_v31 = vpop.f32.mrb[5].mxu1 }
 0x1e7   :  { %v288_v33 = vadd.f32 %v287_v30, %v39_v24  ;;  %v371_v34 = vadd.f32 %v370_v31, %v39_v24 }
 0x1e9   :  { %v293_v36 = vcombine.low %v286_v28, %v288_v33  ;;  %v377_v37 = vcombine.low %v369_v29, %v371_v34 }
 0x1eb   :  { %v295_v38 = vadd.f32 %v293_v36, %v290_v32  ;;  %v379_v39 = vadd.f32 %v377_v37, %v374_v35 }
 0x1ed   :  { %296 = vst [vmem:[%s515_s5] sm:$0xff] %v295_v38  ;;  %397 = vst [vmem:[%s515_s5 + $0x8] sm:$0xff] %v379_v39 }

</bundles_post_ra>
